<compile_context>
chip_gen: v7x
topology: tpu7x:2x2x1
jax: 0.10.0
libtpu: 0.0.40
codegen_flags: <defaults>
</compile_context>

<pallas_src>
import functools

import jax
import jax.numpy as jnp
import numpy as np
from jax import lax
from jax.experimental import pallas as pl
from jax.experimental.pallas import tpu as pltpu


def _round_up(x, m):
    return ((x + m - 1) // m) * m


def _tensorcores_per_chip():
    """Best-effort TensorCores-per-chip query (2 on v7x, 1 on v5e/v6e). Perf-only."""
    try:
        d = jax.devices()[0]
        if d.platform != "tpu":
            return 1
        nc = getattr(d, "num_cores", None)
        if nc:
            return max(1, int(nc))
    except Exception:
        pass
    try:
        info = pltpu.get_tpu_info()
        for attr in ("num_cores", "num_tensorcores", "tensorcores_per_chip", "core_count"):
            v = getattr(info, attr, None)
            if v:
                return max(1, int(v))
    except Exception:
        pass
    return 1


@functools.lru_cache(maxsize=None)
def _fused_dft_basis(n_fft, win_length, num_freqs, f_pad):
    """Host-side (f64) hann-windowed real-DFT basis packed into n_fft columns.

    cols [0, num_freqs)                : real part,  cos(2*pi*k*f/n_fft) * w[k], f=0..num_freqs-1
    cols [num_freqs, num_freqs+n_imag) : imag part, -sin(2*pi*k*f/n_fft) * w[k], f=1..n_imag
    (imag at DC and, for even n_fft, Nyquist is exactly 0 -> reconstructed in epilogue)
    """
    n = np.arange(win_length, dtype=np.float64)
    w = 0.5 - 0.5 * np.cos(2.0 * np.pi * n / win_length)          # periodic hann (torch default)
    if win_length < n_fft:
        lpad = (n_fft - win_length) // 2
        w = np.pad(w, (lpad, n_fft - win_length - lpad))
    k = np.arange(n_fft)
    n_imag = n_fft - num_freqs
    basis = np.zeros((n_fft, f_pad), np.float32)
    f_re = np.arange(num_freqs)
    ang_re = 2.0 * np.pi * ((np.outer(k, f_re) % n_fft).astype(np.float64)) / n_fft
    basis[:, :num_freqs] = (np.cos(ang_re) * w[:, None]).astype(np.float32)
    f_im = np.arange(1, 1 + n_imag)
    ang_im = 2.0 * np.pi * ((np.outer(k, f_im) % n_fft).astype(np.float64)) / n_fft
    basis[:, num_freqs:num_freqs + n_imag] = (-np.sin(ang_im) * w[:, None]).astype(np.float32)
    return basis


def _make_chunk_kernel(tm, hop, rows_copy, prefetch):
    """Fast-path kernel (n_fft == 2*hop): frames built in VMEM from hop-sized chunks.

    chunks_hbm : (G, hop) f32 raw HBM ref (pl.ANY); frame g uses chunk rows g and g+1.
    basis_ref  : (2*hop, f_pad) bf16 fused basis, VMEM resident.
    out_ref    : (tm, f_pad) f32, auto-pipelined writeback.
    """

    def kernel(chunks_hbm, basis_ref, out_ref, buf, sem):
        i = pl.program_id(0)

        def fetch(block, slot):
            pltpu.make_async_copy(chunks_hbm.at[pl.ds(block * tm, rows_copy)],
                                  buf.at[slot], sem.at[slot]).start()

        def wait(block, slot):
            pltpu.make_async_copy(chunks_hbm.at[pl.ds(block * tm, rows_copy)],
                                  buf.at[slot], sem.at[slot]).wait()

        if prefetch:
            slot = i % 2

            @pl.when(i == 0)
            def _():
                fetch(i, slot)

            @pl.when(i + 1 < pl.num_programs(0))
            def _():
                fetch(i + 1, 1 - slot)

            wait(i, slot)
        else:
            slot = 0
            fetch(i, slot)
            wait(i, slot)

        left = buf[slot, pl.ds(0, tm), :].astype(jnp.bfloat16)        # chunk g
        right = buf[slot, pl.ds(1, tm), :].astype(jnp.bfloat16)       # chunk g+1
        out_ref[...] = (
            jnp.dot(left, basis_ref[pl.ds(0, hop), :], preferred_element_type=jnp.float32)
            + jnp.dot(right, basis_ref[pl.ds(hop, hop), :], preferred_element_type=jnp.float32))

    return kernel


def _frames_kernel(frames_ref, basis_ref, out_ref):
    """Generic-path kernel: plain (tm, n_fft) @ (n_fft, f_pad) on the MXU."""
    out_ref[...] = jnp.dot(frames_ref[...], basis_ref[...],
                           preferred_element_type=jnp.float32)


@functools.partial(jax.jit,
                   static_argnames=("n_fft", "hop_length", "win_length", "tm", "cores"))
def _stft_impl(y, n_fft, hop_length, win_length, tm, cores):
    num_dims = y.ndim
    batch_size = y.shape[0]
    num_samples = y.shape[-1]
    y2 = y.reshape(-1, num_samples).astype(jnp.float32)               # (BC, S)
    bc = y2.shape[0]

    pad = n_fft // 2                                                  # center=True
    y_pad = jnp.pad(y2, ((0, 0), (pad, pad)), mode="reflect")

    num_frames = 1 + num_samples // hop_length
    num_freqs = n_fft // 2 + 1
    f_cols = n_fft                                                    # packed real+imag columns
    f_pad = _round_up(f_cols, 128)

    basis = jnp.asarray(
        _fused_dft_basis(n_fft, win_length, num_freqs, f_pad)).astype(jnp.bfloat16)

    fast = (n_fft == 2 * hop_length) and (num_samples % hop_length == 0)

    if fast:
        hop = hop_length
        chunks_per_row = num_frames + 1                               # (S + n_fft) // hop
        rows_valid = bc * chunks_per_row                              # incl. 1 junk frame per row

        if cores > 1:
            tm_eff = min(tm, _round_up(pl.cdiv(rows_valid, cores), 8))
        else:
            tm_eff = min(tm, _round_up(rows_valid, 8))
        tm_eff = max(8, tm_eff)
        nb = pl.cdiv(rows_valid, tm_eff)
        if cores > 1:
            nb = _round_up(nb, cores)                                 # balanced megacore grid
        rows_pad = nb * tm_eff
        rows_copy = tm_eff + 8                                        # +1 chunk (8-row aligned)

        g_real = bc * chunks_per_row
        chunks = y_pad.reshape(-1)
        chunks = jnp.pad(chunks, (0, (rows_pad + 8 - g_real) * hop))  # keep last DMA in bounds
        chunks = chunks.reshape(rows_pad + 8, hop)                    # f32, no sample duplication

        prefetch = cores <= 1                                         # megacore-safe choice
        nslots = 2 if prefetch else 1
        kernel = _make_chunk_kernel(tm_eff, hop, rows_copy, prefetch)

        cost = pl.CostEstimate(
            flops=4 * rows_pad * hop * f_pad,
            transcendentals=0,
            bytes_accessed=chunks.size * 4 + basis.size * 2 + rows_pad * f_pad * 4)

        out_p = pl.pallas_call(
            kernel,
            out_shape=jax.ShapeDtypeStruct((rows_pad, f_pad), jnp.float32),
            grid_spec=pltpu.PrefetchScalarGridSpec(
                num_scalar_prefetch=0,
                grid=(nb,),
                in_specs=[
                    pl.BlockSpec(memory_space=pl.ANY),                # chunks stay in HBM
                    pl.BlockSpec((n_fft, f_pad), lambda i: (0, 0)),   # fused basis
                ],
                out_specs=pl.BlockSpec((tm_eff, f_pad), lambda i: (i, 0)),
                scratch_shapes=[
                    pltpu.VMEM((nslots, rows_copy, hop), jnp.float32),
                    pltpu.SemaphoreType.DMA((nslots,)),
                ]),
            compiler_params=pltpu.CompilerParams(
                dimension_semantics=("arbitrary",) if prefetch else ("parallel",)),
            cost_estimate=cost,
        )(chunks, basis)

        # drop the cross-row junk frame (last of each group) and the grid padding
        stacked = out_p[:rows_valid].reshape(bc, chunks_per_row, f_pad)[:, :num_frames, :]
    else:
        # Generic path: materialize overlapping frames, plain tiled matmul.
        idx = (jnp.arange(num_frames)[:, None] * hop_length + jnp.arange(n_fft)[None, :])
        frames = y_pad[:, idx].reshape(bc * num_frames, n_fft).astype(jnp.bfloat16)
        m = frames.shape[0]
        if cores > 1:
            tm_eff = min(tm, _round_up(pl.cdiv(m, cores), 8))
        else:
            tm_eff = min(tm, _round_up(m, 8))
        tm_eff = max(8, tm_eff)
        nb = pl.cdiv(m, tm_eff)
        if cores > 1:
            nb = _round_up(nb, cores)
        m_pad = nb * tm_eff
        if m_pad != m:
            frames = jnp.pad(frames, ((0, m_pad - m), (0, 0)))
        cost = pl.CostEstimate(
            flops=2 * m_pad * n_fft * f_pad,
            transcendentals=0,
            bytes_accessed=frames.size * 2 + basis.size * 2 + m_pad * f_pad * 4)
        out_p = pl.pallas_call(
            _frames_kernel,
            out_shape=jax.ShapeDtypeStruct((m_pad, f_pad), jnp.float32),
            grid_spec=pltpu.PrefetchScalarGridSpec(
                num_scalar_prefetch=0,
                grid=(nb,),
                in_specs=[
                    pl.BlockSpec((tm_eff, n_fft), lambda i: (i, 0)),
                    pl.BlockSpec((n_fft, f_pad), lambda i: (0, 0)),
                ],
                out_specs=pl.BlockSpec((tm_eff, f_pad), lambda i: (i, 0))),
            compiler_params=pltpu.CompilerParams(
                dimension_semantics=("parallel",)),
            cost_estimate=cost,
        )(frames, basis)
        stacked = out_p[:m].reshape(bc, num_frames, f_pad)

    # Fused epilogue: unpack packed real/imag columns, add exact-zero imag bins,
    # transpose to (..., F, T), mag/phase/complex.
    n_imag = n_fft - num_freqs
    real_tf = stacked[..., :num_freqs]                                # (BC, T, F)
    imag_mid = stacked[..., num_freqs:num_freqs + n_imag]
    z_lead = jnp.zeros_like(real_tf[..., :1])                         # DC imag == 0
    z_trail = jnp.zeros_like(real_tf[..., :num_freqs - 1 - n_imag])   # Nyquist imag == 0
    imag_tf = jnp.concatenate([z_lead, imag_mid, z_trail], axis=-1)

    real = jnp.swapaxes(real_tf, -1, -2)                              # (BC, F, T)
    imag = jnp.swapaxes(imag_tf, -1, -2)
    mag = jnp.sqrt(real * real + imag * imag)
    phase = jnp.arctan2(imag, real)
    complex_stft = lax.complex(real, imag)

    if num_dims == 3:
        out_shape = (batch_size, -1, num_freqs, num_frames)
        mag = mag.reshape(out_shape)
        phase = phase.reshape(out_shape)
        real = real.reshape(out_shape)
        imag = imag.reshape(out_shape)
        complex_stft = complex_stft.reshape(out_shape)

    return mag, phase, real, imag, complex_stft


def stft_forward(y, n_fft=256, hop_length=128, win_length=256, tm=1024):
    """Reproduces STFT.forward: returns (mag, phase, real, imag, complex_stft)."""
    num_dims = y.ndim
    assert num_dims in (2, 3), "Only support 2D or 3D Input"
    assert win_length <= n_fft, "win_length must be <= n_fft (torch.stft requirement)"
    assert y.shape[-1] > n_fft // 2, "num_samples must exceed n_fft//2 (reflect padding)"
    cores = _tensorcores_per_chip()
    return _stft_impl(y, n_fft=n_fft, hop_length=hop_length,
                      win_length=win_length, tm=tm, cores=cores)


def _np_stft_ref(y, n_fft, hop, win_length):
    """Plain-numpy f64 reference of the same math (torch.stft convention)."""
    y2 = np.asarray(y, np.float64).reshape(-1, y.shape[-1])
    pad = n_fft // 2
    ypad = np.pad(y2, ((0, 0), (pad, pad)), mode="reflect")
    T = 1 + y.shape[-1] // hop
    F = n_fft // 2 + 1
    n = np.arange(win_length, dtype=np.float64)
    w = 0.5 - 0.5 * np.cos(2.0 * np.pi * n / win_length)
    if win_length < n_fft:
        lpad = (n_fft - win_length) // 2
        w = np.pad(w, (lpad, n_fft - win_length - lpad))
    idx = np.arange(T)[:, None] * hop + np.arange(n_fft)[None, :]
    fr = ypad[:, idx] * w[None, None, :]
    ang = 2.0 * np.pi * np.arange(n_fft)[:, None] * np.arange(F)[None, :] / n_fft
    re = np.einsum("btn,nf->btf", fr, np.cos(ang)).transpose(0, 2, 1)
    im = np.einsum("btn,nf->btf", fr, -np.sin(ang)).transpose(0, 2, 1)
    return re, im


if __name__ == "__main__":
    key = jax.random.PRNGKey(0)
    # 3D input: (batch=2, channels=2, num_samples=512) -> F=129, T=5
    y = jax.random.normal(key, (2, 2, 512), dtype=jnp.float32)

    mag, phase, real, imag, cstft = stft_forward(y)
    jax.block_until_ready((mag, phase, real, imag, cstft))

    assert mag.shape == (2, 2, 129, 5), mag.shape
    assert phase.shape == (2, 2, 129, 5), phase.shape
    assert real.shape == (2, 2, 129, 5), real.shape
    assert imag.shape == (2, 2, 129, 5), imag.shape
    assert cstft.dtype == jnp.complex64

    # numeric sanity vs f64 reference (tolerance covers bf16 frame/basis quantization
    # with f32 MXU accumulation)
    ref_re, ref_im = _np_stft_ref(np.asarray(y), 256, 128, 256)
    np.testing.assert_allclose(np.asarray(real).reshape(4, 129, 5), ref_re,
                               rtol=5e-2, atol=2.5e-1)
    np.testing.assert_allclose(np.asarray(imag).reshape(4, 129, 5), ref_im,
                               rtol=5e-2, atol=2.5e-1)
    np.testing.assert_allclose(np.asarray(mag).reshape(4, 129, 5),
                               np.sqrt(ref_re ** 2 + ref_im ** 2),
                               rtol=5e-2, atol=2.5e-1)

    # 2D input path (same fast kernel)
    y2d = jax.random.normal(jax.random.PRNGKey(1), (3, 512), dtype=jnp.float32)
    out2 = stft_forward(y2d)
    jax.block_until_ready(out2)
    assert out2[0].shape == (3, 129, 5), out2[0].shape

    # generic (n_fft != 2*hop) fallback path
    y3 = jax.random.normal(jax.random.PRNGKey(2), (2, 500), dtype=jnp.float32)
    m3, p3, r3, i3, c3 = stft_forward(y3, n_fft=256, hop_length=100, win_length=256)
    jax.block_until_ready(r3)
    assert r3.shape == (2, 129, 6), r3.shape
    ref_re3, ref_im3 = _np_stft_ref(np.asarray(y3), 256, 100, 256)
    np.testing.assert_allclose(np.asarray(r3), ref_re3, rtol=5e-2, atol=2.5e-1)
    np.testing.assert_allclose(np.asarray(i3), ref_im3, rtol=5e-2, atol=2.5e-1)

    print("KERNEL_OK")
</pallas_src>

<mosaic_0001>
module attributes {stable_mosaic.version = 11 : i64} {
  func.func @kernel(%arg0: i32, %arg1: memref<32x128xf32, #tpu.memory_space<any>>, %arg2: memref<256x256xbf16, #tpu.memory_space<vmem>>, %arg3: memref<24x256xf32, #tpu.memory_space<vmem>>, %arg4: memref<2x32x128xf32, #tpu.memory_space<vmem>>, %arg5: memref<2x!tpu.dma_semaphore, #tpu.memory_space<semaphore_mem>>) attributes {dimension_semantics = [#tpu.dimension_semantics<arbitrary>], iteration_bounds = array<i64: 1>, scalar_prefetch = 0 : i64, scratch_operands = 2 : i64, tpu.core_type = #tpu.core_type<tc>, window_params = [{}, {pipeline_mode = #tpu.pipeline_mode<synchronous>, transform_indices = @transform_1, window_bounds = array<i64: 256, 256>}, {transform_indices = @transform_2, window_bounds = array<i64: 24, 256>}]} {
    %c2_i32 = arith.constant 2 : i32
    %c0_i32 = arith.constant 0 : i32
    %0 = arith.cmpi eq, %c2_i32, %c0_i32 : i32
    %c1_i32 = arith.constant 1 : i32
    %1 = arith.select %0, %c1_i32, %c2_i32 : i32
    %2 = arith.remsi %arg0, %1 : i32
    %c0_i32_0 = arith.constant 0 : i32
    %3 = arith.cmpi ne, %2, %c0_i32_0 : i32
    %c0_i32_1 = arith.constant 0 : i32
    %4 = arith.cmpi slt, %2, %c0_i32_1 : i32
    %c0_i32_2 = arith.constant 0 : i32
    %5 = arith.cmpi slt, %1, %c0_i32_2 : i32
    %6 = arith.xori %4, %5 : i1
    %7 = arith.andi %6, %3 : i1
    %8 = arith.addi %2, %1 : i32
    %9 = arith.select %7, %8, %2 : i32
    %c0_i32_3 = arith.constant 0 : i32
    %10 = arith.cmpi eq, %arg0, %c0_i32_3 : i32
    %11 = arith.extui %10 : i1 to i32
    %c0_i32_4 = arith.constant 0 : i32
    %12 = arith.cmpi ne, %11, %c0_i32_4 : i32
    scf.if %12 {
      %c24_i32_19 = arith.constant 24 : i32
      %37 = arith.muli %arg0, %c24_i32_19 : i32
      %c0_i32_20 = arith.constant 0 : i32
      %38 = tpu.memref_slice %arg1[%37, %c0_i32_20] : memref<32x128xf32, #tpu.memory_space<any>> -> memref<32x128xf32, #tpu.memory_space<any>>
      %c0_i32_21 = arith.constant 0 : i32
      %c0_i32_22 = arith.constant 0 : i32
      %39 = tpu.memref_slice %arg4[%9, %c0_i32_21, %c0_i32_22] : memref<2x32x128xf32, #tpu.memory_space<vmem>> -> memref<1x32x128xf32, #tpu.memory_space<vmem>>
      %40 = tpu.memref_squeeze %39 : memref<1x32x128xf32, #tpu.memory_space<vmem>> -> memref<32x128xf32, #tpu.memory_space<vmem>>
      %41 = tpu.memref_slice %arg5[%9] : memref<2x!tpu.dma_semaphore, #tpu.memory_space<semaphore_mem>> -> memref<1x!tpu.dma_semaphore, #tpu.memory_space<semaphore_mem>>
      %42 = tpu.memref_squeeze %41 : memref<1x!tpu.dma_semaphore, #tpu.memory_space<semaphore_mem>> -> memref<!tpu.dma_semaphore, #tpu.memory_space<semaphore_mem>>
      tpu.enqueue_dma source(%38 : memref<32x128xf32, #tpu.memory_space<any>>) target(%40 : memref<32x128xf32, #tpu.memory_space<vmem>>) target_semaphore(%42 : memref<!tpu.dma_semaphore, #tpu.memory_space<semaphore_mem>>)
    } else {
    }
    %c1_i32_5 = arith.constant 1 : i32
    %13 = arith.addi %arg0, %c1_i32_5 : i32
    %c1_i32_6 = arith.constant 1 : i32
    %14 = arith.cmpi slt, %13, %c1_i32_6 : i32
    %15 = arith.extui %14 : i1 to i32
    %c0_i32_7 = arith.constant 0 : i32
    %16 = arith.cmpi ne, %15, %c0_i32_7 : i32
    scf.if %16 {
      %c1_i32_19 = arith.constant 1 : i32
      %37 = arith.addi %arg0, %c1_i32_19 : i32
      %c1_i32_20 = arith.constant 1 : i32
      %38 = arith.subi %c1_i32_20, %9 : i32
      %c24_i32_21 = arith.constant 24 : i32
      %39 = arith.muli %37, %c24_i32_21 : i32
      %c0_i32_22 = arith.constant 0 : i32
      %40 = tpu.memref_slice %arg1[%39, %c0_i32_22] : memref<32x128xf32, #tpu.memory_space<any>> -> memref<32x128xf32, #tpu.memory_space<any>>
      %c0_i32_23 = arith.constant 0 : i32
      %c0_i32_24 = arith.constant 0 : i32
      %41 = tpu.memref_slice %arg4[%38, %c0_i32_23, %c0_i32_24] : memref<2x32x128xf32, #tpu.memory_space<vmem>> -> memref<1x32x128xf32, #tpu.memory_space<vmem>>
      %42 = tpu.memref_squeeze %41 : memref<1x32x128xf32, #tpu.memory_space<vmem>> -> memref<32x128xf32, #tpu.memory_space<vmem>>
      %43 = tpu.memref_slice %arg5[%38] : memref<2x!tpu.dma_semaphore, #tpu.memory_space<semaphore_mem>> -> memref<1x!tpu.dma_semaphore, #tpu.memory_space<semaphore_mem>>
      %44 = tpu.memref_squeeze %43 : memref<1x!tpu.dma_semaphore, #tpu.memory_space<semaphore_mem>> -> memref<!tpu.dma_semaphore, #tpu.memory_space<semaphore_mem>>
      tpu.enqueue_dma source(%40 : memref<32x128xf32, #tpu.memory_space<any>>) target(%42 : memref<32x128xf32, #tpu.memory_space<vmem>>) target_semaphore(%44 : memref<!tpu.dma_semaphore, #tpu.memory_space<semaphore_mem>>)
    } else {
    }
    %c24_i32 = arith.constant 24 : i32
    %17 = arith.muli %arg0, %c24_i32 : i32
    %c0_i32_8 = arith.constant 0 : i32
    %18 = tpu.memref_slice %arg1[%17, %c0_i32_8] : memref<32x128xf32, #tpu.memory_space<any>> -> memref<32x128xf32, #tpu.memory_space<any>>
    %c0_i32_9 = arith.constant 0 : i32
    %c0_i32_10 = arith.constant 0 : i32
    %19 = tpu.memref_slice %arg4[%9, %c0_i32_9, %c0_i32_10] : memref<2x32x128xf32, #tpu.memory_space<vmem>> -> memref<1x32x128xf32, #tpu.memory_space<vmem>>
    %20 = tpu.memref_squeeze %19 : memref<1x32x128xf32, #tpu.memory_space<vmem>> -> memref<32x128xf32, #tpu.memory_space<vmem>>
    %21 = tpu.memref_slice %arg5[%9] : memref<2x!tpu.dma_semaphore, #tpu.memory_space<semaphore_mem>> -> memref<1x!tpu.dma_semaphore, #tpu.memory_space<semaphore_mem>>
    %22 = tpu.memref_squeeze %21 : memref<1x!tpu.dma_semaphore, #tpu.memory_space<semaphore_mem>> -> memref<!tpu.dma_semaphore, #tpu.memory_space<semaphore_mem>>
    tpu.wait_dma2 semaphore(%22 : memref<!tpu.dma_semaphore, #tpu.memory_space<semaphore_mem>>) src(%18 : memref<32x128xf32, #tpu.memory_space<any>>) dst(%20 : memref<32x128xf32, #tpu.memory_space<vmem>>)
    %23 = arith.index_cast %9 : i32 to index
    %c0 = arith.constant 0 : index
    %c0_11 = arith.constant 0 : index
    %24 = vector.load %arg4[%23, %c0, %c0_11] : memref<2x32x128xf32, #tpu.memory_space<vmem>>, vector<1x24x128xf32>
    %25 = vector.shape_cast %24 : vector<1x24x128xf32> to vector<24x128xf32>
    %26 = arith.truncf %25 : vector<24x128xf32> to vector<24x128xbf16>
    %27 = arith.index_cast %9 : i32 to index
    %c1 = arith.constant 1 : index
    %c0_12 = arith.constant 0 : index
    %28 = vector.load %arg4[%27, %c1, %c0_12] : memref<2x32x128xf32, #tpu.memory_space<vmem>>, vector<1x24x128xf32>
    %29 = vector.shape_cast %28 : vector<1x24x128xf32> to vector<24x128xf32>
    %30 = arith.truncf %29 : vector<24x128xf32> to vector<24x128xbf16>
    %c0_13 = arith.constant 0 : index
    %c0_14 = arith.constant 0 : index
    %31 = vector.load %arg2[%c0_13, %c0_14] : memref<256x256xbf16, #tpu.memory_space<vmem>>, vector<128x256xbf16>
    %cst = arith.constant dense<0.000000e+00> : vector<24x256xf32>
    %32 = tpu.matmul %26, %31, %cst {dimension_numbers = #tpu.dot_dimension_numbers<[1], [0], [0], [1], [0, 0, 1, 1], [], []>} : vector<24x128xbf16>, vector<128x256xbf16>, vector<24x256xf32> -> vector<24x256xf32>
    %c128 = arith.constant 128 : index
    %c0_15 = arith.constant 0 : index
    %33 = vector.load %arg2[%c128, %c0_15] : memref<256x256xbf16, #tpu.memory_space<vmem>>, vector<128x256xbf16>
    %cst_16 = arith.constant dense<0.000000e+00> : vector<24x256xf32>
    %34 = tpu.matmul %30, %33, %cst_16 {dimension_numbers = #tpu.dot_dimension_numbers<[1], [0], [0], [1], [0, 0, 1, 1], [], []>} : vector<24x128xbf16>, vector<128x256xbf16>, vector<24x256xf32> -> vector<24x256xf32>
    %35 = arith.addf %32, %34 : vector<24x256xf32>
    %c0_17 = arith.constant 0 : index
    %c0_18 = arith.constant 0 : index
    %36 = vector.load %arg3[%c0_17, %c0_18] : memref<24x256xf32, #tpu.memory_space<vmem>>, vector<24x256xf32>
    tpu.vector_store %arg3[%c0_17, %c0_18], %35 {strides = array<i32>} : memref<24x256xf32, #tpu.memory_space<vmem>>, vector<24x256xf32>,
    return
  }
  func.func @transform_1(%arg0: i32) -> (i32, i32) {
    %c0_i32 = arith.constant 0 : i32
    %c0_i32_0 = arith.constant 0 : i32
    %c0_i32_1 = arith.constant 0 : i32
    return %c0_i32, %c0_i32_0 : i32, i32
  }
  func.func @transform_2(%arg0: i32) -> (i32, i32) {
    %c0_i32 = arith.constant 0 : i32
    %c0_i32_0 = arith.constant 0 : i32
    return %arg0, %c0_i32 : i32, i32
  }
}

</mosaic_0001>

<bundles_post_ra>
// kernel: custom-call
= control target key start
LH: loop header
LB: loop body
LE: loop exit
PB: predicated region body
PF: predicated region fallthrough
CT: control target
= control target key end

     0   :  { %s137_s0 = inlined_call_operand.vmem [shape: f32[2,2,129,5], index: 0, kind: input, shape index: {}]   ;;  %s138_s1 = inlined_call_operand.vmem [shape: f32[2,2,129,5], index: 1, kind: input, shape index: {}]   ;;  %s139_s2 = inlined_call_operand.vmem [shape: c64[2,2,129,5], index: 2, kind: output, shape index: {}]  }
   0x1   :  { %v5_v0 = vld [vmem:[%s137_s0] sm:$0xff]  ;;  %v45_v1 = vld [vmem:[%s137_s0 + $0x8] sm:$0xff]  ;;  %v47_v2 = vld [vmem:[%s137_s0 + $0x10] sm:$0xff] }
   0x2   :  { %6 = vst [vmem:[%s139_s2] sm:$0xff] %v5_v0  ;;  %46 = vst [vmem:[%s139_s2 + $0x8] sm:$0xff] %v45_v1  ;;  %v49_v3 = vld [vmem:[%s137_s0 + $0x18] sm:$0xff]  ;;  %v51_v4 = vld [vmem:[%s137_s0 + $0x20] sm:$0xff] }
   0x3   :  { %48 = vst [vmem:[%s139_s2 + $0x10] sm:$0xff] %v47_v2  ;;  %v23_v5 = vld [vmem:[%s138_s1] sm:$0xff]  ;;  %50 = vst [vmem:[%s139_s2 + $0x18] sm:$0xff] %v49_v3  ;;  %v54_v6 = vld [vmem:[%s138_s1 + $0x8] sm:$0xff] }
   0x4   :  { %52 = vst [vmem:[%s139_s2 + $0x20] sm:$0xff] %v51_v4  ;;  %53 = vst [vmem:[%s139_s2 + $0x28] sm:$0xff] %v23_v5  ;;  %v56_v7 = vld [vmem:[%s138_s1 + $0x10] sm:$0xff]  ;;  %v58_v8 = vld [vmem:[%s138_s1 + $0x18] sm:$0xff] }
   0x5   :  { %55 = vst [vmem:[%s139_s2 + $0x30] sm:$0xff] %v54_v6  ;;  %57 = vst [vmem:[%s139_s2 + $0x38] sm:$0xff] %v56_v7  ;;  %v60_v9 = vld [vmem:[%s138_s1 + $0x20] sm:$0xff] }
   0x6   :  { %59 = vst [vmem:[%s139_s2 + $0x40] sm:$0xff] %v58_v8  ;;  %61 = vst [vmem:[%s139_s2 + $0x48] sm:$0xff] %v60_v9 }

// kernel: _stft_impl.1
= control target key start
LH: loop header
LB: loop body
LE: loop exit
PB: predicated region body
PF: predicated region fallthrough
CT: control target
= control target key end

     0   :  { %s735_s0 = inlined_call_operand.vmem [shape: f32[32,128], index: 0, kind: input, shape index: {}]   ;;  %s736_s1 = inlined_call_operand.vmem [shape: bf16[256,256], index: 1, kind: input, shape index: {}]   ;;  %s737_s2 = inlined_call_operand.vmem [shape: f32[24,256], index: 2, kind: output, shape index: {}]  }
   0x1   :  { %v59_v0 = vld [vmem:[%s735_s0] sm:$0xff]  ;;  %v61_v1 = vld [vmem:[%s735_s0 + $0x8] sm:$0xff]  ;;  %v63_v2 = vld [vmem:[%s735_s0 + $0x10] sm:$0xff] }
   0x2   :  { %60 = vst [vmem:[#allocation2] sm:$0xff] %v59_v0  ;;  %62 = vst [vmem:[#allocation2 + $0x8] sm:$0xff] %v61_v1  ;;  %v65_v3 = vld [vmem:[%s735_s0 + $0x18] sm:$0xff] }
   0x3   :  { %64 = vst [vmem:[#allocation2 + $0x10] sm:$0xff] %v63_v2  ;;  %66 = vst [vmem:[#allocation2 + $0x18] sm:$0xff] %v65_v3 }
   0x4   :  { %74 = vsyncadd [#allocation3], 512 }
   0x5   :  { %587 = dma.done.wait [#allocation3], 512 }
   0x6   :  { %588 = vsyncadd [#allocation3], 4294966784  ;;  %v589_v4 = vmov 0   ;;  %v539_v5 = vld [vmem:[%s736_s1 + $0x84] ss:$8 sps:$4 sm:$0xff]  }
   0x7   :  { %294 = vmatprep.mubr.bf16.mxu1 %v589_v4  ;;  %425 = vmatprep.mubr.bf16.mxu0 %v589_v4  ;;  %v541_v6 = vld [vmem:[%s736_s1 + $0x4] ss:$8 sps:$4 sm:$0xff]   ;;  %v543_v7 = vld [vmem:[%s736_s1 + $0x80] ss:$8 sps:$4 sm:$0xff]   ;;  %v545_v9 = vld [vmem:[%s736_s1 + $0x94] ss:$8 sps:$4 sm:$0xff]  }
   0x8   :  { %262 = vmatprep.subr.bf16.mxu1 %v539_v5  ;;  %v544_v8 = vld [vmem:[%s736_s1] ss:$8 sps:$4 sm:$0xff]   ;;  %393 = vmatprep.subr.bf16.mxu0 %v541_v6  ;;  %v547_v10 = vld [vmem:[%s736_s1 + $0x14] ss:$8 sps:$4 sm:$0xff]   ;;  %v549_v11 = vld [vmem:[%s736_s1 + $0x90] ss:$8 sps:$4 sm:$0xff]  }
   0x9   :  { %263 = vmatpush1.bf16.msra.mxu1 %v543_v7  ;;  %394 = vmatpush1.bf16.msra.mxu0 %v544_v8  ;;  %v550_v12 = vld [vmem:[%s736_s1 + $0x10] ss:$8 sps:$4 sm:$0xff]   ;;  %v551_v13 = vld [vmem:[%s736_s1 + $0xa4] ss:$8 sps:$4 sm:$0xff]   ;;  %v555_v15 = vld [vmem:[%s736_s1 + $0xa0] ss:$8 sps:$4 sm:$0xff]  }
   0xa   :  { %264 = vmatprep.subr.bf16.mxu1 %v545_v9  ;;  %395 = vmatprep.subr.bf16.mxu0 %v547_v10  ;;  %v553_v14 = vld [vmem:[%s736_s1 + $0x24] ss:$8 sps:$4 sm:$0xff]   ;;  %v556_v16 = vld [vmem:[%s736_s1 + $0x20] ss:$8 sps:$4 sm:$0xff]   ;;  %v557_v17 = vld [vmem:[%s736_s1 + $0xb4] ss:$8 sps:$4 sm:$0xff]  }
   0xb   :  { %v559_v18 = vld [vmem:[%s736_s1 + $0x34] ss:$8 sps:$4 sm:$0xff]   ;;  %v561_v19 = vld [vmem:[%s736_s1 + $0xb0] ss:$8 sps:$4 sm:$0xff]   ;;  %v563_v21 = vld [vmem:[%s736_s1 + $0xc4] ss:$8 sps:$4 sm:$0xff]  }
   0xc   :  { %v562_v20 = vld [vmem:[%s736_s1 + $0x30] ss:$8 sps:$4 sm:$0xff]   ;;  %v565_v22 = vld [vmem:[%s736_s1 + $0x44] ss:$8 sps:$4 sm:$0xff]   ;;  %v567_v23 = vld [vmem:[%s736_s1 + $0xc0] ss:$8 sps:$4 sm:$0xff]  }
   0xd   :  { %265 = vmatpush1.bf16.msra.mxu1 %v549_v11  ;;  %396 = vmatpush1.bf16.msra.mxu0 %v550_v12  ;;  %v568_v24 = vld [vmem:[%s736_s1 + $0x40] ss:$8 sps:$4 sm:$0xff]   ;;  %v569_v25 = vld [vmem:[%s736_s1 + $0xd4] ss:$8 sps:$4 sm:$0xff]   ;;  %v573_v27 = vld [vmem:[%s736_s1 + $0xd0] ss:$8 sps:$4 sm:$0xff]  }
   0xe   :  { %266 = vmatprep.subr.bf16.mxu1 %v551_v13  ;;  %397 = vmatprep.subr.bf16.mxu0 %v553_v14  ;;  %v571_v26 = vld [vmem:[%s736_s1 + $0x54] ss:$8 sps:$4 sm:$0xff]   ;;  %v574_v28 = vld [vmem:[%s736_s1 + $0x50] ss:$8 sps:$4 sm:$0xff]   ;;  %v575_v29 = vld [vmem:[%s736_s1 + $0xe4] ss:$8 sps:$4 sm:$0xff]  }
   0xf   :  { %v577_v30 = vld [vmem:[%s736_s1 + $0x64] ss:$8 sps:$4 sm:$0xff]   ;;  %v579_v31 = vld [vmem:[%s736_s1 + $0xe0] ss:$8 sps:$4 sm:$0xff]   ;;  %v581_v33 = vld [vmem:[%s736_s1 + $0xf4] ss:$8 sps:$4 sm:$0xff]  }
  0x10   :  { %v580_v32 = vld [vmem:[%s736_s1 + $0x60] ss:$8 sps:$4 sm:$0xff]   ;;  %v583_v34 = vld [vmem:[%s736_s1 + $0x74] ss:$8 sps:$4 sm:$0xff]   ;;  %v585_v35 = vld [vmem:[%s736_s1 + $0xf0] ss:$8 sps:$4 sm:$0xff]  }
  0x11   :  { %267 = vmatpush1.bf16.msra.mxu1 %v555_v15  ;;  %398 = vmatpush1.bf16.msra.mxu0 %v556_v16  ;;  %v586_v36 = vld [vmem:[%s736_s1 + $0x70] ss:$8 sps:$4 sm:$0xff]   ;;  %v145_v37 = vld [vmem:[#allocation2 + $0x1] sm:$0xff] }
  0x12   :  { %268 = vmatprep.subr.bf16.mxu1 %v557_v17  ;;  %399 = vmatprep.subr.bf16.mxu0 %v559_v18  ;;  %v146_v38 = vld [vmem:[#allocation2 + $0x9] sm:$0xff]  ;;  %v140_v39 = vld [vmem:[#allocation2] sm:$0xff]  ;;  %v147_v43 = vld [vmem:[#allocation2 + $0x11] sm:$0xff] }
  0x13   :  { %v141_v40 = vld [vmem:[#allocation2 + $0x8] sm:$0xff]  ;;  %v148_v41 = vpack.c.bf16 %v146_v38, %v145_v37  ;;  %v142_v44 = vld [vmem:[#allocation2 + $0x10] sm:$0xff]  ;;  %v149_v45 = vpack.c.bf16 %v147_v43, %v147_v43 }
  0x14   :  { %v143_v42 = vpack.c.bf16 %v141_v40, %v140_v39  ;;  %v144_v46 = vpack.c.bf16 %v142_v44, %v142_v44 }
  0x15   :  { %269 = vmatpush1.bf16.msra.mxu1 %v561_v19  ;;  %400 = vmatpush1.bf16.msra.mxu0 %v562_v20 }
  0x16   :  { %270 = vmatprep.subr.bf16.mxu1 %v563_v21  ;;  %401 = vmatprep.subr.bf16.mxu0 %v565_v22 }
  0x19   :  { %271 = vmatpush1.bf16.msra.mxu1 %v567_v23  ;;  %402 = vmatpush1.bf16.msra.mxu0 %v568_v24 }
  0x1a   :  { %272 = vmatprep.subr.bf16.mxu1 %v569_v25  ;;  %403 = vmatprep.subr.bf16.mxu0 %v571_v26 }
  0x1d   :  { %273 = vmatpush1.bf16.msra.mxu1 %v573_v27  ;;  %404 = vmatpush1.bf16.msra.mxu0 %v574_v28 }
  0x1e   :  { %274 = vmatprep.subr.bf16.mxu1 %v575_v29  ;;  %405 = vmatprep.subr.bf16.mxu0 %v577_v30 }
  0x21   :  { %275 = vmatpush1.bf16.msra.mxu1 %v579_v31  ;;  %406 = vmatpush1.bf16.msra.mxu0 %v580_v32 }
  0x22   :  { %276 = vmatprep.subr.bf16.mxu1 %v581_v33  ;;  %407 = vmatprep.subr.bf16.mxu0 %v583_v34 }
  0x25   :  { %277 = vmatpush1.bf16.msra.mxu1 %v585_v35  ;;  %408 = vmatpush1.bf16.msra.mxu0 %v586_v36 }
  0x28   :  { %295 = vmatmul.mubr.bf16.vlgmr.msra.gmra.mrb[0].mxu1 %v148_v41  ;;  %426 = vmatmul.mubr.bf16.vlgmr.msra.gmra.mrb[0].mxu0 %v143_v42 }
  0x29   :  { %304 = vmatprep.mubr.bf16.mxu1 %v589_v4  ;;  %435 = vmatprep.mubr.bf16.mxu0 %v589_v4 }
  0x30   :  { %305 = vmatmul.mubr.bf16.gmra.mrb[4].mxu1 %v149_v45  ;;  %436 = vmatmul.mubr.bf16.gmra.mrb[4].mxu0 %v144_v46 }
  0xfb   :  { %v296_v47 = vpop.f32.mrb[0].mxu1  ;;  %v427_v48 = vpop.f32.mrb[0].mxu0 }
  0xfc   :  { %v428_v49 = vadd.f32 %v427_v48, %v296_v47  ;;  %v298_v50 = vpop.f32.mrb[1].mxu1  ;;  %v429_v51 = vpop.f32.mrb[1].mxu0 }
  0xfd   :  { %v430_v52 = vadd.f32 %v429_v51, %v298_v50  ;;  %v300_v53 = vpop.f32.mrb[2].mxu1  ;;  %v431_v54 = vpop.f32.mrb[2].mxu0 }
  0xfe   :  { %444 = vst [vmem:[%s737_s2] sm:$0xff] %v428_v49  ;;  %v432_v55 = vadd.f32 %v431_v54, %v300_v53  ;;  %v302_v56 = vpop.f32.mrb[3].mxu1  ;;  %v433_v57 = vpop.f32.mrb[3].mxu0 }
  0xff   :  { %445 = vst [vmem:[%s737_s2 + $0x8] sm:$0xff] %v430_v52  ;;  %v434_v58 = vadd.f32 %v433_v57, %v302_v56 }
 0x100   :  { %446 = vst [vmem:[%s737_s2 + $0x10] sm:$0xff] %v432_v55 }
 0x101   :  { %447 = vst [vmem:[%s737_s2 + $0x18] sm:$0xff] %v434_v58 }
 0x103   :  { %v306_v59 = vpop.f32.mrb[4].mxu1  ;;  %v437_v60 = vpop.f32.mrb[4].mxu0 }
 0x104   :  { %v438_v61 = vadd.f32 %v437_v60, %v306_v59  ;;  %v308_v62 = vpop.f32.mrb[5].mxu1  ;;  %v439_v63 = vpop.f32.mrb[5].mxu0 }
 0x105   :  { %v440_v0 = vadd.f32 %v439_v63, %v308_v62  ;;  %v310_v1 = vpop.f32.mrb[6].mxu1  ;;  %v441_v2 = vpop.f32.mrb[6].mxu0 }
 0x106   :  { %448 = vst [vmem:[%s737_s2 + $0x20] sm:$0xff] %v438_v61  ;;  %v311_v3 = vpop.f32.mrb[7].mxu1  ;;  %v442_v4 = vpop.f32.mrb[7].mxu0 }
 0x107   :  { %449 = vst [vmem:[%s737_s2 + $0x28] sm:$0xff] %v440_v0 }
 0x108   :  { %454 = vsyncmov [#allocation3] }
 0x10b   :  { %s455_s5 = vpop.sfrf %454 }
 0x10c   :  { %p530_p0 = scmp.ne.s32.totalorder %s455_s5, 0 }
 0x10e   :  { %459 = shalt.err (%p530_p0)  }
 0x10f   :  { %461 = vsyncmov [#allocation3 + $0x1] }
 0x112   :  { %s462_s6 = vpop.sfrf %461 }
 0x113   :  { %p531_p1 = scmp.ne.s32.totalorder %s462_s6, 0 }
 0x115   :  { %466 = shalt.err (%p531_p1)  }

</bundles_post_ra>
